<compile_context>
chip_gen: v6e
topology: v6e:2x2x1
jax: 0.10.0
libtpu: 0.0.40
codegen_flags: <defaults>
</compile_context>

<pallas_src>
import functools

import jax
import jax.numpy as jnp
from jax.experimental import pallas as pl
from jax.experimental.pallas import tpu as pltpu


# Per-tile logical budget (f32-equivalent bytes).  4 pipeline buffers plus f32
# intermediates stay well under the 32 MiB scoped VMEM default and far under
# v7x's 64 MiB physical VMEM, while still being big enough to sit at the HBM
# roofline (measured ~85% at ~1 MiB tiles on v6e).
_TILE_BUDGET_BYTES = 1 << 20
_MIN_TILE_BYTES_FOR_BW = 256 << 10   # don't shrink tiles below this for megacore


def _round_up(x, m):
    return ((x + m - 1) // m) * m


def _finish_softmax(e, s, out_dtype):
    # EUP approximate reciprocal (frees VALU slots) + one Newton-Raphson step
    # to restore ~f32 accuracy.  s = sum(exp(x - max)) >= 1, so well conditioned.
    inv = pl.reciprocal(s, approx=True)
    inv = inv * (2.0 - s * inv)
    return (e * inv).astype(out_dtype)


def _softmax_last_kernel(t_ref, x_ref, o_ref, *, apply_temp):
    # x_ref / o_ref: (TN, M) VMEM tile; softmax over the lane (last) axis.
    x = x_ref[...].astype(jnp.float32)
    if apply_temp:
        x = x * t_ref[0, 0]
    m = jnp.max(x, axis=-1, keepdims=True)
    e = jnp.exp(x - m)
    s = jnp.sum(e, axis=-1, keepdims=True)
    o_ref[...] = _finish_softmax(e, s, o_ref.dtype)


def _softmax_middle_kernel(t_ref, x_ref, o_ref, *, apply_temp):
    # x_ref / o_ref: (TO, D, inner) VMEM tile; softmax over axis=1 (sublanes).
    x = x_ref[...].astype(jnp.float32)
    if apply_temp:
        x = x * t_ref[0, 0]
    m = jnp.max(x, axis=1, keepdims=True)
    e = jnp.exp(x - m)
    s = jnp.sum(e, axis=1, keepdims=True)
    o_ref[...] = _finish_softmax(e, s, o_ref.dtype)


def softmax_affinity_norm(affinities, *, dim, temperature=None, row_block=None):
    """Pallas equivalent of SoftmaxAffinityNorm(temperature)(affinities, dim=dim).

    `row_block` optionally overrides the row-tile size for the last-dim path
    (must be a multiple of the sublane packing, or >= number of rows).
    """
    ndim = affinities.ndim
    if ndim == 0:
        raise ValueError("affinities must have at least one dimension")
    dim = dim % ndim
    shape = affinities.shape

    apply_temp = temperature is not None
    # Runtime SMEM scalar -> no recompile per temperature value.
    t = jnp.full((1, 1), temperature if apply_temp else 1.0, dtype=jnp.float32)

    itemsize = jnp.dtype(affinities.dtype).itemsize
    sub = 8 * max(1, 4 // itemsize)          # sublane packing: 8 f32 / 16 bf16 / 32 i8

    if dim == ndim - 1:
        # ---- softmax over the last (lane) axis: view as (rows, M) ----
        M = shape[-1]
        rows = 1
        for s in shape[:-1]:
            rows *= s
        x_in = affinities.reshape(rows, M)

        row_bytes_f32 = _round_up(M, 128) * 4          # padded f32 bytes per row
        if row_block is not None:
            tn = min(int(row_block), rows)
        else:
            tn = _TILE_BUDGET_BYTES // row_bytes_f32
            tn = min(1024, max(sub, (tn // sub) * sub))
            # v7x has 2 TensorCores: prefer >= ~8 parallel grid steps when that
            # does not push tiles below the bandwidth-friendly size.
            min_tn_for_bw = max(sub, (_MIN_TILE_BYTES_FOR_BW // row_bytes_f32) // sub * sub)
            tn_for_8_steps = _round_up(pl.cdiv(rows, 8), sub)
            if tn_for_8_steps >= min_tn_for_bw:
                tn = min(tn, tn_for_8_steps)
        if rows <= tn:
            tn = rows                                   # single full-extent block

        grid = (pl.cdiv(rows, tn),)
        data_spec = pl.BlockSpec((tn, M), lambda i: (i, 0))
        kernel = functools.partial(_softmax_last_kernel, apply_temp=apply_temp)
        out_shape = jax.ShapeDtypeStruct((rows, M), affinities.dtype)
        tile_f32_bytes = tn * row_bytes_f32
    else:
        # ---- softmax over a middle axis: view as (outer, D, inner), no transpose ----
        D = shape[dim]
        outer = 1
        for s in shape[:dim]:
            outer *= s
        inner = 1
        for s in shape[dim + 1:]:
            inner *= s
        x_in = affinities.reshape(outer, D, inner)

        slab_bytes_f32 = _round_up(D, 8) * _round_up(inner, 128) * 4
        to = max(1, _TILE_BUDGET_BYTES // slab_bytes_f32)
        to_for_8_steps = max(1, pl.cdiv(outer, 8))
        if to_for_8_steps * slab_bytes_f32 >= _MIN_TILE_BYTES_FOR_BW:
            to = min(to, to_for_8_steps)
        to = min(to, outer)
        # TODO(synk): for very large D*inner (tile would exceed VMEM, esp. on
        # v7x's 64 MiB), add an inner/lane grid axis with an online softmax.

        grid = (pl.cdiv(outer, to),)
        data_spec = pl.BlockSpec((to, D, inner), lambda i: (i, 0, 0))
        kernel = functools.partial(_softmax_middle_kernel, apply_temp=apply_temp)
        out_shape = jax.ShapeDtypeStruct((outer, D, inner), affinities.dtype)
        tile_f32_bytes = to * slab_bytes_f32

    # Explicit VMEM budget: 2x double-buffered (in + out) tiles plus f32
    # intermediates and headroom; capped so it stays safe on v7x (64 MiB VMEM).
    vmem_limit = int(min(48 << 20, max(32 << 20, 6 * tile_f32_bytes + (8 << 20))))

    out = pl.pallas_call(
        kernel,
        out_shape=out_shape,
        grid_spec=pltpu.PrefetchScalarGridSpec(
            num_scalar_prefetch=0,
            grid=grid,
            in_specs=[
                pl.BlockSpec(memory_space=pltpu.MemorySpace.SMEM),  # temperature
                data_spec,
            ],
            out_specs=data_spec,
        ),
        compiler_params=pltpu.CompilerParams(
            dimension_semantics=("parallel",) * len(grid),
            vmem_limit_bytes=vmem_limit,
        ),
    )(t, x_in)

    return out.reshape(shape)


if __name__ == "__main__":
    key = jax.random.PRNGKey(0)
    k1, k2, k3 = jax.random.split(key, 3)

    temperature = 0.5  # deterministic "parameter" from __init__

    # 1) Affinity matrix: batch=2, 16 "query" nodes x 128 "reference" nodes,
    #    normalize over the last dim (reference nodes sum to 1).
    B, N, M = 2, 16, 128
    affinities = jax.random.normal(k1, (B, N, M), dtype=jnp.float32)
    out = jax.block_until_ready(
        softmax_affinity_norm(affinities, dim=-1, temperature=temperature)
    )
    ref = jax.nn.softmax(affinities * temperature, axis=-1)
    assert out.shape == affinities.shape
    assert jnp.allclose(out, ref, atol=1e-5, rtol=1e-5)
    assert jnp.allclose(jnp.sum(out, axis=-1), 1.0, atol=1e-5)

    # 2) Normalize over a non-last dim (dim=1): in-kernel sublane softmax,
    #    no wrapper transpose.
    out_d1 = jax.block_until_ready(
        softmax_affinity_norm(affinities, dim=1, temperature=temperature)
    )
    ref_d1 = jax.nn.softmax(affinities * temperature, axis=1)
    assert jnp.allclose(out_d1, ref_d1, atol=1e-5, rtol=1e-5)

    # 3) 4-D input, odd softmax extent, no temperature.
    x4 = jax.random.normal(k2, (2, 5, 8, 16), dtype=jnp.float32)
    out4 = jax.block_until_ready(softmax_affinity_norm(x4, dim=1))
    ref4 = jax.nn.softmax(x4, axis=1)
    assert jnp.allclose(out4, ref4, atol=1e-5, rtol=1e-5)

    # 4) Last-dim path with a partial (masked) row block: rows % TN != 0.
    x2 = jax.random.normal(k3, (20, 96), dtype=jnp.float32)
    out2 = jax.block_until_ready(
        softmax_affinity_norm(x2, dim=-1, temperature=2.0, row_block=8)
    )
    ref2 = jax.nn.softmax(x2 * 2.0, axis=-1)
    assert jnp.allclose(out2, ref2, atol=1e-5, rtol=1e-5)

    print("KERNEL_OK")
</pallas_src>

<mosaic_0001>
module attributes {stable_mosaic.version = 11 : i64} {
  func.func @_softmax_last_kernel(%arg0: i32, %arg1: memref<1x1xf32, #tpu.memory_space<smem>>, %arg2: memref<32x128xf32, #tpu.memory_space<vmem>>, %arg3: memref<32x128xf32, #tpu.memory_space<vmem>>) attributes {dimension_semantics = [#tpu.dimension_semantics<parallel>], iteration_bounds = array<i64: 1>, scalar_prefetch = 0 : i64, scratch_operands = 0 : i64, tpu.core_type = #tpu.core_type<tc>, window_params = [{transform_indices = @transform_0, window_bounds = array<i64: 1, 1>}, {transform_indices = @transform_1, window_bounds = array<i64: 32, 128>}, {transform_indices = @transform_2, window_bounds = array<i64: 32, 128>}]} {
    %c0 = arith.constant 0 : index
    %c0_0 = arith.constant 0 : index
    %0 = vector.load %arg2[%c0, %c0_0] : memref<32x128xf32, #tpu.memory_space<vmem>>, vector<32x128xf32>
    %c0_1 = arith.constant 0 : index
    %c0_2 = arith.constant 0 : index
    %1 = memref.load %arg1[%c0_1, %c0_2] : memref<1x1xf32, #tpu.memory_space<smem>>
    %2 = vector.broadcast %1 : f32 to vector<32x128xf32>
    %3 = arith.mulf %0, %2 : vector<32x128xf32>
    %cst = arith.constant dense<0xFF800000> : vector<32xf32>
    %4 = vector.multi_reduction <maximumf>, %3, %cst [1] : vector<32x128xf32> to vector<32xf32>
    %5 = vector.shape_cast %4 : vector<32xf32> to vector<32x1xf32>
    %6 = vector.broadcast %5 : vector<32x1xf32> to vector<32x128xf32>
    %7 = arith.subf %3, %6 : vector<32x128xf32>
    %8 = math.exp %7 : vector<32x128xf32>
    %cst_3 = arith.constant dense<0.000000e+00> : vector<32xf32>
    %9 = vector.multi_reduction <add>, %8, %cst_3 [1] : vector<32x128xf32> to vector<32xf32>
    %10 = vector.shape_cast %9 : vector<32xf32> to vector<32x1xf32>
    %11 = tpu.reciprocal %10 {approx = true} : vector<32x1xf32> -> vector<32x1xf32>
    %12 = arith.mulf %10, %11 : vector<32x1xf32>
    %cst_4 = arith.constant 2.000000e+00 : f32
    %13 = vector.broadcast %cst_4 : f32 to vector<32x1xf32>
    %14 = arith.subf %13, %12 : vector<32x1xf32>
    %15 = arith.mulf %11, %14 : vector<32x1xf32>
    %16 = vector.broadcast %15 : vector<32x1xf32> to vector<32x128xf32>
    %17 = arith.mulf %8, %16 : vector<32x128xf32>
    %c0_5 = arith.constant 0 : index
    %c0_6 = arith.constant 0 : index
    %18 = vector.load %arg3[%c0_5, %c0_6] : memref<32x128xf32, #tpu.memory_space<vmem>>, vector<32x128xf32>
    tpu.vector_store %arg3[%c0_5, %c0_6], %17 {strides = array<i32>} : memref<32x128xf32, #tpu.memory_space<vmem>>, vector<32x128xf32>,
    return
  }
  func.func @transform_0(%arg0: i32) -> (i32, i32) {
    %c0_i32 = arith.constant 0 : i32
    %c0_i32_0 = arith.constant 0 : i32
    %c0_i32_1 = arith.constant 0 : i32
    return %c0_i32, %c0_i32_0 : i32, i32
  }
  func.func @transform_1(%arg0: i32) -> (i32, i32) {
    %c0_i32 = arith.constant 0 : i32
    %c0_i32_0 = arith.constant 0 : i32
    return %arg0, %c0_i32 : i32, i32
  }
  func.func @transform_2(%arg0: i32) -> (i32, i32) {
    %c0_i32 = arith.constant 0 : i32
    %c0_i32_0 = arith.constant 0 : i32
    return %arg0, %c0_i32 : i32, i32
  }
}

</mosaic_0001>

<bundles_post_ra>
// kernel: tpu_custom_call.1
= control target key start
LH: loop header
LB: loop body
LE: loop exit
PB: predicated region body
PF: predicated region fallthrough
CT: control target
= control target key end

     0   :  { %8 = vsyncpa [#allocation4], 0  ;;  %s204_s0 = inlined_call_operand.<no memory space> [shape: f32[1,1], index: 0, kind: input, shape index: {}]   ;;  %s205_s1 = inlined_call_operand.hbm [shape: f32[32,128], index: 1, kind: input, shape index: {}]   ;;  %s206_s2 = inlined_call_operand.hbm [shape: f32[32,128], index: 2, kind: output, shape index: {}]  }
   0x1   :  { %9 = vsyncpa [#allocation5], 0  ;;  %s170_s9 = smov [#allocation3]  }
   0x2   :  { %s17_s10 = sshll.u32 %s170_s9, 4  ;;  %s18_s10 = int_to_ptr.vmem [resolvable:$true] %s17_s10 }
   0x3   :  { %s134_s11 = scalar_lea.vmem %s18_s10, 512  ;;  %p139_p1 = scmp.lt.s32.totalorder %s18_s10, %s18_s10 }
   0x4   :  { %p135_p0 = scmp.ne.s32.totalorder %s18_s10, %s134_s11  ;;  %p140_p2 = scmp.lt.s32.totalorder %s134_s11, %s134_s11 }
   0x6   :  { %p141_p3 = por %p140_p2, %p139_p1 }
   0x8   :  { %p142_p4 = pnand %p141_p3, %p135_p0 }
   0xa   :  { %145 = shalt.err (!%p142_p4)
}
   0xb   :  { %s171_s12 = smov 128   ;;  %s172_s13 = smov 8  }
   0xc   :  { %23 = dma.hbm_to_vmem [thread:$0]  %s205_s1, 512, %s18_s10, [#allocation4], %s171_s12, %s171_s12, %s172_s13  }
   0xd   :  { %166 = dma.done.wait [#allocation4], 512  }
   0xe   :  { %167 = vsyncadd [#allocation4], 4294966784  ;;  %v32_v0 = vstv %s204_s0  ;;  %v27_v1 = vld [vmem:[#allocation3] sm:$0xff]  ;;  %v29_v2 = vld [vmem:[#allocation3 + $0x10] sm:$0xff]  ;;  %s173_s0 = smov [#allocation6]  }
   0xf   :  { %v28_v3 = vld [vmem:[#allocation3 + $0x8] sm:$0xff]  ;;  %v33_v4 = vmul.f32 %v32_v0, %v27_v1  ;;  %v35_v5 = vmul.f32 %v32_v0, %v29_v2  ;;  %v30_v6 = vld [vmem:[#allocation3 + $0x18] sm:$0xff]  ;;  %s94_s1 = sshll.u32 %s173_s0, 4  ;;  %s95_s1 = int_to_ptr.vmem [resolvable:$true] %s94_s1 }
  0x10   :  { %v34_v7 = vmul.f32 %v32_v0, %v28_v3  ;;  %v36_v8 = vmul.f32 %v32_v0, %v30_v6  ;;  %s146_s18 = scalar_lea.vmem %s95_s1, 512  ;;  %p151_p6 = scmp.lt.s32.totalorder %s95_s1, %s95_s1 }
  0x11   :  { %37 = vmax.xlane.f32.xlu0 %v33_v4  ;;  %41 = vmax.xlane.f32.xlu1 %v35_v5  ;;  %p147_p5 = scmp.ne.s32.totalorder %s95_s1, %s146_s18  ;;  %p152_p7 = scmp.lt.s32.totalorder %s146_s18, %s146_s18 }
  0x13   :  { %p153_p8 = por %p152_p7, %p151_p6 }
  0x15   :  { %39 = vmax.xlane.f32.xlu0 %v34_v7  ;;  %43 = vmax.xlane.f32.xlu1 %v36_v8  ;;  %p154_p9 = pnand %p153_p8, %p147_p5 }
  0x9a   :  { %v38_v9 = vpop.xlane.xlu0 %37  ;;  %v42_v10 = vpop.xlane.xlu1 %41 }
  0x9b   :  { %v45_v11 = vsub.f32 %v33_v4, %v38_v9  ;;  %v47_v12 = vsub.f32 %v35_v5, %v42_v10 }
  0x9d   :  { %v49_v13 = vmul.f32 1.442695, %v45_v11  ;;  %v53_v14 = vmul.f32 1.442695, %v47_v12 }
  0x9e   :  { %v40_v15 = vpop.xlane.xlu0 %39  ;;  %v44_v16 = vpop.xlane.xlu1 %43 }
  0x9f   :  { %110 = vpow2.f32 %v49_v13  ;;  %v46_v17 = vsub.f32 %v34_v7, %v40_v15  ;;  %v48_v18 = vsub.f32 %v36_v8, %v44_v16 }
  0xa0   :  { %112 = vpow2.f32 %v53_v14 }
  0xa1   :  { %v51_v19 = vmul.f32 1.442695, %v46_v17  ;;  %v55_v20 = vmul.f32 1.442695, %v48_v18 }
  0xa3   :  { %114 = vpow2.f32 %v51_v19 }
  0xa4   :  { %116 = vpow2.f32 %v55_v20 }
  0xac   :  { %v111_v21 = vpop.eup %110 }
  0xad   :  { %57 = vadd.xlane.f32.xlu0 %v111_v21  ;;  %v113_v22 = vpop.eup %112 }
  0xb0   :  { %v115_v23 = vpop.eup %114 }
  0xb1   :  { %61 = vadd.xlane.f32.xlu0 %v113_v22  ;;  %59 = vadd.xlane.f32.xlu1 %v115_v23  ;;  %v117_v24 = vpop.eup %116 }
  0xb5   :  { %63 = vadd.xlane.f32.xlu1 %v117_v24 }
 0x136   :  { %v58_v25 = vpop.xlane.xlu0 %57 }
 0x137   :  { %118 = vrcp.f32 %v58_v25 }
 0x13a   :  { %v60_v26 = vpop.xlane.xlu1 %59  ;;  %v62_v27 = vpop.xlane.xlu0 %61 }
 0x13b   :  { %120 = vrcp.f32 %v60_v26 }
 0x13c   :  { %122 = vrcp.f32 %v62_v27 }
 0x13e   :  { %v64_v28 = vpop.xlane.xlu1 %63 }
 0x13f   :  { %124 = vrcp.f32 %v64_v28 }
 0x144   :  { %v119_v29 = vpop.eup %118 }
 0x145   :  { %v69_v30 = vmul.f32 %v119_v29, %v58_v25 }
 0x147   :  { %v73_v31 = vsub.f32 2.0, %v69_v30 }
 0x148   :  { %v121_v32 = vpop.eup %120 }
 0x149   :  { %v123_v33 = vpop.eup %122  ;;  %v77_v34 = vmul.f32 %v119_v29, %v73_v31  ;;  %v70_v35 = vmul.f32 %v121_v32, %v60_v26 }
 0x14a   :  { %v71_v36 = vmul.f32 %v123_v33, %v62_v27 }
 0x14b   :  { %v81_v37 = vmul.f32 %v111_v21, %v77_v34  ;;  %v74_v38 = vsub.f32 2.0, %v70_v35 }
 0x14c   :  { %v125_v39 = vpop.eup %124  ;;  %v75_v40 = vsub.f32 2.0, %v71_v36 }
 0x14d   :  { %85 = vst [vmem:[#allocation6] sm:$0xff] %v81_v37  ;;  %v78_v41 = vmul.f32 %v121_v32, %v74_v38  ;;  %v72_v42 = vmul.f32 %v125_v39, %v64_v28 }
 0x14e   :  { %v79_v43 = vmul.f32 %v123_v33, %v75_v40 }
 0x14f   :  { %v82_v44 = vmul.f32 %v115_v23, %v78_v41  ;;  %v76_v45 = vsub.f32 2.0, %v72_v42 }
 0x150   :  { %v83_v46 = vmul.f32 %v113_v22, %v79_v43 }
 0x151   :  { %86 = vst [vmem:[#allocation6 + $0x8] sm:$0xff] %v82_v44  ;;  %v80_v47 = vmul.f32 %v125_v39, %v76_v45 }
 0x152   :  { %87 = vst [vmem:[#allocation6 + $0x10] sm:$0xff] %v83_v46 }
 0x153   :  { %v84_v48 = vmul.f32 %v117_v24, %v80_v47 }
 0x155   :  { %88 = vst [vmem:[#allocation6 + $0x18] sm:$0xff] %v84_v48 }
 0x156   :  { %157 = shalt.err (!%p154_p9)
}
 0x157   :  { %100 = dma.vmem_to_hbm [thread:$0]  %s95_s1, 512, %s206_s2, [#allocation5], %s171_s12, %s171_s12, %s172_s13  }
 0x158   :  { %168 = dma.done.wait [#allocation5], 512  }
 0x159   :  { %169 = vsyncadd [#allocation5], 4294966784 }
 0x15a   :  { %104 = vsyncpa [#allocation4], 1 }
 0x15b   :  { %105 = vsyncpa [#allocation5], 1 }

</bundles_post_ra>
